<compile_context>
chip_gen: v7x
topology: tpu7x:2x2x1
jax: 0.10.0
libtpu: 0.0.40
codegen_flags: <defaults>
</compile_context>

<pallas_src>
import functools

import jax
import jax.numpy as jnp
from jax import lax
from jax.experimental import pallas as pl
from jax.experimental.pallas import tpu as pltpu


def _round_up(x, m):
    return (x + m - 1) // m * m


def _sublane_multiple(dtype):
    # native packed sublane tile: f32 -> 8, bf16 -> 16, int8/bool -> 32
    return {1: 32, 2: 16, 4: 8}.get(jnp.dtype(dtype).itemsize, 8)


def _pick_tile_rows(n_rows, n_cols, itemsize, mult, budget_bytes):
    """Rows per tile: multiple of `mult`, one tile ~budget_bytes, capped at the array."""
    row_bytes = max(_round_up(n_cols, 128) * itemsize, 1)
    t = (budget_bytes // row_bytes) // mult * mult
    t = max(t, mult)
    return int(min(t, _round_up(n_rows, mult)))


def _pick_fold_rows(tile_rows, mult, n_cols):
    """Inner-slab rows: divisor of tile_rows, >= packing mult, sized so the slab's
    f32 working set stays a few vregs wide (no register spills for wide lanes)."""
    cap = mult * max(1, min(4, 512 // max(int(n_cols), 128)))
    fold = mult
    while fold * 2 <= cap and tile_rows % (fold * 2) == 0:
        fold *= 2
    return fold


def _vmem_tile_bytes(rows, cols, dtype):
    it = jnp.dtype(dtype).itemsize
    return _round_up(rows, _sublane_multiple(dtype)) * _round_up(cols, 128) * it


def _fold_to_8(x, rows, cols):
    """Fold a (rows, cols) f32 value into (8, cols) by summing 8-row groups.

    rows is a small multiple of 8 (<= 4 groups), so this unrolls to at most 3
    vreg-aligned adds."""
    acc = x[0:8, :]
    for k in range(1, rows // 8):
        acc = acc + x[k * 8:(k + 1) * 8, :]
    return acc


def _importance_loss_kernel(out_ref, tgt_ref, mask_ref, r1_ref,     # inputs (VMEM tiles)
                            loss_ref,                               # output (SMEM scalar)
                            acc_se_ref, acc_m_ref, acc_r_ref,       # VMEM accumulators
                            *, w_1, n_experts, groups,
                            b_rows, r_rows, tb, tr, fold_b, fold_r,
                            nb, nr, guard_base, guard_router):
    i = pl.program_id(0)
    T = out_ref.shape[1]
    rC = r1_ref.shape[1]

    # ---- init grid-carried accumulators -----------------------------------------
    @pl.when(i == 0)
    def _init():
        acc_se_ref[...] = jnp.zeros_like(acc_se_ref)
        acc_m_ref[...] = jnp.zeros_like(acc_m_ref)
        acc_r_ref[...] = jnp.zeros_like(acc_r_ref)

    # ---- base-loss stream: masked squared error + mask mass ----------------------
    def _base_update():
        iota_b = lax.broadcasted_iota(jnp.int32, (fold_b, 1), 0)

        def body(kk, carry):
            se_f, mm_f = carry
            r0 = pl.multiple_of(kk * fold_b, fold_b)
            o = out_ref[pl.ds(r0, fold_b), :].astype(jnp.float32)
            t = tgt_ref[pl.ds(r0, fold_b), :].astype(jnp.float32)
            m = mask_ref[pl.ds(r0, fold_b), :].astype(jnp.float32)
            row = iota_b + i * tb + kk * fold_b
            valid = row < b_rows                      # masks the partial edge slab
            d = o - t
            se = jnp.where(valid, d * d * m, 0.0)     # where, not *: garbage may be nan
            mm = jnp.where(valid, m, 0.0)
            se_f = se_f + _fold_to_8(se, fold_b, T)
            mm_f = mm_f + _fold_to_8(mm, fold_b, T)
            return se_f, mm_f

        init = (jnp.zeros((8, T), jnp.float32), jnp.zeros((8, T), jnp.float32))
        se_f, mm_f = lax.fori_loop(0, tb // fold_b, body, init)
        acc_se_ref[...] += se_f                       # one accumulator touch per step
        acc_m_ref[...] += mm_f

    if guard_base:
        pl.when(i < nb)(_base_update)
    else:
        _base_update()

    # ---- router stream: per-lane partial sums ------------------------------------
    def _router_update():
        iota_r = lax.broadcasted_iota(jnp.int32, (fold_r, 1), 0)

        def body(kk, r_f):
            r0 = pl.multiple_of(kk * fold_r, fold_r)
            r = r1_ref[pl.ds(r0, fold_r), :].astype(jnp.float32)
            row = iota_r + i * tr + kk * fold_r
            r = jnp.where(row < r_rows, r, 0.0)
            return r_f + _fold_to_8(r, fold_r, rC)

        r_f = lax.fori_loop(0, tr // fold_r, body, jnp.zeros((8, rC), jnp.float32))
        acc_r_ref[...] += r_f

    if guard_router:
        pl.when(i < nr)(_router_update)
    else:
        _router_update()

    # ---- finalize: one epilogue with all cross-lane / cross-sublane reductions ----
    @pl.when(i == pl.num_programs(0) - 1)
    def _finalize():
        sum_se = jnp.sum(acc_se_ref[...])
        sum_m = jnp.sum(acc_m_ref[...])
        b_loss = sum_se / (sum_m + 1e-8)

        r_acc = jnp.sum(acc_r_ref[...], axis=0, keepdims=True)    # (1, rC)
        # Lane-dense layout: lane l of r_acc holds a partial sum for expert (l % E).
        # Circularly rolling by multiples of E and summing gives the full per-expert
        # totals replicated `groups` times across the 128 lanes (XLU only, epilogue).
        r_full = r_acc
        for g in range(1, groups):
            r_full = r_full + pltpu.roll(r_acc, shift=g * n_experts, axis=1)

        # mean / unbiased variance over the E experts, accounting for `groups`-fold
        # replication of each expert total across lanes.
        mean = jnp.sum(r_full) / (groups * n_experts)
        var = jnp.sum((r_full - mean) ** 2) / (groups * (n_experts - 1))
        denom = mean + 1e-8
        # cv**2 == (sqrt(var)/(mean+eps))**2 == var/(mean+eps)**2 : drop the sqrt.
        loss_ref[0, 0] = b_loss + w_1 * (var / (denom * denom))


def importance_regulated_loss(outputs, targets, router_1, router_2, mask,
                              w_1=0.1, tile_rows_base=None, tile_rows_router=None,
                              tile_budget_bytes=2 * 1024 * 1024):
    """Pallas implementation of ImportanceRegulatedLoss.forward (masked-MSE base loss)."""
    del router_2  # unused in the torch forward as well

    # Flatten prediction tensors to 2D [rows, last_dim]; lane axis = last dim.
    outputs = outputs.reshape(-1, outputs.shape[-1])
    targets = targets.reshape(-1, targets.shape[-1])
    mask = mask.reshape(-1, mask.shape[-1])
    if not (outputs.shape == targets.shape == mask.shape):
        raise ValueError("outputs / targets / mask must share a shape")
    if router_1.ndim != 2:
        raise ValueError("router_1 must be [n_tokens, n_experts]")
    n_experts = int(router_1.shape[1])
    if n_experts < 2:
        raise ValueError("torch.std(ddof=1) needs at least 2 experts")

    B, T = map(int, outputs.shape)
    N, E = map(int, router_1.shape)

    # Router lane-dense re-view (free, contiguous reshape — no HBM copy) when the
    # flattened stream tiles exactly into 128-lane rows and experts divide 128.
    if E <= 128 and 128 % E == 0 and (N * E) % 128 == 0:
        router_view = router_1.reshape((N * E) // 128, 128)
        groups = 128 // E
    else:
        router_view = router_1
        groups = 1
    R_rows, rC = map(int, router_view.shape)

    # Dtype-aware tiling (mask may be int8/bool, activations bf16 — no upcast here).
    base_mult = max(_sublane_multiple(outputs.dtype), _sublane_multiple(targets.dtype),
                    _sublane_multiple(mask.dtype))
    r_mult = _sublane_multiple(router_view.dtype)
    base_item = max(jnp.dtype(outputs.dtype).itemsize, jnp.dtype(targets.dtype).itemsize,
                    jnp.dtype(mask.dtype).itemsize)
    r_item = jnp.dtype(router_view.dtype).itemsize

    tb = tile_rows_base if tile_rows_base else _pick_tile_rows(
        B, T, base_item, base_mult, tile_budget_bytes)
    tr = tile_rows_router if tile_rows_router else _pick_tile_rows(
        R_rows, rC, r_item, r_mult, tile_budget_bytes)
    tb = min(_round_up(int(tb), base_mult), _round_up(B, base_mult))
    tr = min(_round_up(int(tr), r_mult), _round_up(R_rows, r_mult))
    fold_b = _pick_fold_rows(tb, base_mult, T)
    fold_r = _pick_fold_rows(tr, r_mult, rC)

    # Decoupled tile counts; shorter stream is clamped to its last real block and its
    # accumulation is pl.when-guarded (no zero DMA, no wrapper-side padding copies).
    nb = pl.cdiv(B, tb)
    nr = pl.cdiv(R_rows, tr)
    g = max(nb, nr)
    guard_base = nb < g
    guard_router = nr < g
    base_map = (lambda i: (jnp.minimum(i, nb - 1), 0)) if guard_base else (lambda i: (i, 0))
    r_map = (lambda i: (jnp.minimum(i, nr - 1), 0)) if guard_router else (lambda i: (i, 0))

    base_spec = pl.BlockSpec((tb, T), base_map)        # lane dim = full T
    router_spec = pl.BlockSpec((tr, rC), r_map)        # lane dim = full rC

    # Real double-buffered VMEM footprint (3 base streams + router, x2 buffers, + accs);
    # leave margin, stay well under v7x's 64 MiB physical VMEM.
    footprint = 2 * (_vmem_tile_bytes(tb, T, outputs.dtype)
                     + _vmem_tile_bytes(tb, T, targets.dtype)
                     + _vmem_tile_bytes(tb, T, mask.dtype)
                     + _vmem_tile_bytes(tr, rC, router_view.dtype))
    footprint += 2 * _vmem_tile_bytes(8, T, jnp.float32) + _vmem_tile_bytes(8, rC, jnp.float32)
    vmem_limit = int(min(max(footprint * 3 // 2 + (4 << 20), 16 << 20), 48 << 20))

    kernel = functools.partial(
        _importance_loss_kernel,
        w_1=float(w_1), n_experts=n_experts, groups=groups,
        b_rows=B, r_rows=R_rows, tb=tb, tr=tr, fold_b=fold_b, fold_r=fold_r,
        nb=nb, nr=nr, guard_base=guard_base, guard_router=guard_router)

    out = pl.pallas_call(
        kernel,
        out_shape=jax.ShapeDtypeStruct((1, 1), jnp.float32),
        grid=(g,),
        in_specs=[base_spec, base_spec, base_spec, router_spec],
        out_specs=pl.BlockSpec(memory_space=pltpu.MemorySpace.SMEM),
        scratch_shapes=[
            pltpu.VMEM((8, T), jnp.float32),    # accumulated masked squared error
            pltpu.VMEM((8, T), jnp.float32),    # accumulated mask mass
            pltpu.VMEM((8, rC), jnp.float32),   # accumulated router weights (per lane)
        ],
        compiler_params=pltpu.CompilerParams(
            dimension_semantics=("arbitrary",),         # sequential reduction axis
            vmem_limit_bytes=vmem_limit),
    )(outputs, targets, mask, router_view)
    return out[0, 0]


def _reference(outputs, targets, router_1, router_2, mask, w_1=0.1):
    """Pure-JAX reference mirroring the torch semantics (masked-MSE base loss)."""
    del router_2
    b_loss = jnp.sum(mask * (outputs - targets) ** 2) / (jnp.sum(mask) + 1e-8)
    r_summed = jnp.sum(router_1, axis=0)
    cv = jnp.std(r_summed, ddof=1) / (jnp.mean(r_summed) + 1e-8)
    return b_loss + w_1 * cv ** 2


if __name__ == "__main__":
    key = jax.random.PRNGKey(0)
    k1, k2, k3, k4, k5 = jax.random.split(key, 5)

    B, T = 27, 128      # outputs / targets / mask rows x lane dim (27 -> partial edge tile)
    N, E = 40, 16       # router tokens x experts (40*16 = 5 lane-dense rows of 128)

    outputs = jax.random.normal(k1, (B, T), dtype=jnp.float32)
    targets = jax.random.normal(k2, (B, T), dtype=jnp.float32)
    mask = (jax.random.uniform(k3, (B, T)) > 0.5).astype(jnp.float32)
    router_1 = jax.nn.softmax(jax.random.normal(k4, (N, E), dtype=jnp.float32), axis=-1)
    router_2 = jax.nn.softmax(jax.random.normal(k5, (N, E), dtype=jnp.float32), axis=-1)

    # Test 1: small explicit tiles -> 4-step pipelined grid, partial edge tiles on
    # both streams, clamped+guarded router stream (router finishes after 1 tile).
    loss = importance_regulated_loss(outputs, targets, router_1, router_2, mask,
                                     w_1=0.1, tile_rows_base=8, tile_rows_router=8)
    loss = jax.block_until_ready(loss)
    ref = _reference(outputs, targets, router_1, router_2, mask, w_1=0.1)
    assert jnp.allclose(loss, ref, rtol=1e-5, atol=1e-5), (loss, ref)

    # Test 2: auto-tiled path with narrow storage dtypes (bf16 activations, int8 mask)
    # -> dtype-aware sublane rounding, single big tile, in-kernel f32 upcast.
    out_bf = outputs.astype(jnp.bfloat16)
    tgt_bf = targets.astype(jnp.bfloat16)
    mask_i8 = mask.astype(jnp.int8)
    loss2 = importance_regulated_loss(out_bf, tgt_bf, router_1, router_2, mask_i8, w_1=0.1)
    loss2 = jax.block_until_ready(loss2)
    ref2 = _reference(out_bf.astype(jnp.float32), tgt_bf.astype(jnp.float32),
                      router_1, router_2, mask_i8.astype(jnp.float32), w_1=0.1)
    assert jnp.allclose(loss2, ref2, rtol=1e-4, atol=1e-4), (loss2, ref2)

    print("KERNEL_OK")
</pallas_src>

<mosaic_0001>
module attributes {stable_mosaic.version = 11 : i64} {
  func.func @_importance_loss_kernel(%arg0: i32, %arg1: memref<8x128xf32, #tpu.memory_space<vmem>>, %arg2: memref<8x128xf32, #tpu.memory_space<vmem>>, %arg3: memref<8x128xf32, #tpu.memory_space<vmem>>, %arg4: memref<8x128xf32, #tpu.memory_space<vmem>>, %arg5: memref<1x1xf32, #tpu.memory_space<smem>>, %arg6: memref<8x128xf32, #tpu.memory_space<vmem>>, %arg7: memref<8x128xf32, #tpu.memory_space<vmem>>, %arg8: memref<8x128xf32, #tpu.memory_space<vmem>>) attributes {dimension_semantics = [#tpu.dimension_semantics<arbitrary>], iteration_bounds = array<i64: 4>, scalar_prefetch = 0 : i64, scratch_operands = 3 : i64, tpu.core_type = #tpu.core_type<tc>, window_params = [{transform_indices = @transform_0, window_bounds = array<i64: 8, 128>}, {transform_indices = @transform_1, window_bounds = array<i64: 8, 128>}, {transform_indices = @transform_2, window_bounds = array<i64: 8, 128>}, {transform_indices = @transform_3, window_bounds = array<i64: 8, 128>}, {transform_indices = @transform_4, window_bounds = array<i64: 1, 1>}]} {
    %c0_i32 = arith.constant 0 : i32
    %0 = arith.cmpi eq, %arg0, %c0_i32 : i32
    %1 = arith.extui %0 : i1 to i32
    %c0_i32_0 = arith.constant 0 : i32
    %2 = arith.cmpi ne, %1, %c0_i32_0 : i32
    scf.if %2 {
      %cst_20 = arith.constant 0.000000e+00 : f32
      %47 = vector.broadcast %cst_20 : f32 to vector<8x128xf32>
      %c0_21 = arith.constant 0 : index
      %c0_22 = arith.constant 0 : index
      %48 = vector.load %arg6[%c0_21, %c0_22] : memref<8x128xf32, #tpu.memory_space<vmem>>, vector<8x128xf32>
      tpu.vector_store %arg6[%c0_21, %c0_22], %47 {strides = array<i32>} : memref<8x128xf32, #tpu.memory_space<vmem>>, vector<8x128xf32>,
      %cst_23 = arith.constant 0.000000e+00 : f32
      %49 = vector.broadcast %cst_23 : f32 to vector<8x128xf32>
      %c0_24 = arith.constant 0 : index
      %c0_25 = arith.constant 0 : index
      %50 = vector.load %arg7[%c0_24, %c0_25] : memref<8x128xf32, #tpu.memory_space<vmem>>, vector<8x128xf32>
      tpu.vector_store %arg7[%c0_24, %c0_25], %49 {strides = array<i32>} : memref<8x128xf32, #tpu.memory_space<vmem>>, vector<8x128xf32>,
      %cst_26 = arith.constant 0.000000e+00 : f32
      %51 = vector.broadcast %cst_26 : f32 to vector<8x128xf32>
      %c0_27 = arith.constant 0 : index
      %c0_28 = arith.constant 0 : index
      %52 = vector.load %arg8[%c0_27, %c0_28] : memref<8x128xf32, #tpu.memory_space<vmem>>, vector<8x128xf32>
      tpu.vector_store %arg8[%c0_27, %c0_28], %51 {strides = array<i32>} : memref<8x128xf32, #tpu.memory_space<vmem>>, vector<8x128xf32>,
    } else {
    }
    %3 = tpu.iota {dimensions = array<i32: 0>} : vector<8x1xi32>
    %cst = arith.constant 0.000000e+00 : f32
    %4 = vector.broadcast %cst : f32 to vector<8x128xf32>
    %cst_1 = arith.constant 0.000000e+00 : f32
    %5 = vector.broadcast %cst_1 : f32 to vector<8x128xf32>
    %c0_i32_2 = arith.constant 0 : i32
    %c8_i32 = arith.constant 8 : i32
    %6 = arith.muli %c0_i32_2, %c8_i32 : i32
    %7 = tpu.assume_multiple %6, 8 : i32
    %8 = arith.index_cast %7 : i32 to index
    %c0 = arith.constant 0 : index
    %9 = vector.load %arg1[%8, %c0] : memref<8x128xf32, #tpu.memory_space<vmem>>, vector<8x128xf32>
    %10 = arith.index_cast %7 : i32 to index
    %c0_3 = arith.constant 0 : index
    %11 = vector.load %arg2[%10, %c0_3] : memref<8x128xf32, #tpu.memory_space<vmem>>, vector<8x128xf32>
    %12 = arith.index_cast %7 : i32 to index
    %c0_4 = arith.constant 0 : index
    %13 = vector.load %arg3[%12, %c0_4] : memref<8x128xf32, #tpu.memory_space<vmem>>, vector<8x128xf32>
    %c8_i32_5 = arith.constant 8 : i32
    %14 = arith.muli %arg0, %c8_i32_5 : i32
    %15 = vector.broadcast %14 : i32 to vector<8x1xi32>
    %16 = arith.addi %3, %15 : vector<8x1xi32>
    %c8_i32_6 = arith.constant 8 : i32
    %17 = arith.muli %c0_i32_2, %c8_i32_6 : i32
    %18 = vector.broadcast %17 : i32 to vector<8x1xi32>
    %19 = arith.addi %16, %18 : vector<8x1xi32>
    %c27_i32 = arith.constant 27 : i32
    %20 = vector.broadcast %c27_i32 : i32 to vector<8x1xi32>
    %21 = arith.cmpi slt, %19, %20 : vector<8x1xi32>
    %22 = arith.subf %9, %11 : vector<8x128xf32>
    %23 = arith.mulf %22, %22 : vector<8x128xf32>
    %24 = arith.mulf %23, %13 : vector<8x128xf32>
    %cst_7 = arith.constant 0.000000e+00 : f32
    %25 = vector.shape_cast %21 : vector<8x1xi1> to vector<8x1xi1>
    %26 = vector.broadcast %25 : vector<8x1xi1> to vector<8x128xi1>
    %27 = vector.broadcast %cst_7 : f32 to vector<8x128xf32>
    %28 = arith.select %26, %24, %27 : vector<8x128xi1>, vector<8x128xf32>
    %cst_8 = arith.constant 0.000000e+00 : f32
    %29 = vector.shape_cast %21 : vector<8x1xi1> to vector<8x1xi1>
    %30 = vector.broadcast %29 : vector<8x1xi1> to vector<8x128xi1>
    %31 = vector.broadcast %cst_8 : f32 to vector<8x128xf32>
    %32 = arith.select %30, %13, %31 : vector<8x128xi1>, vector<8x128xf32>
    %33 = arith.addf %4, %28 : vector<8x128xf32>
    %34 = arith.addf %5, %32 : vector<8x128xf32>
    %c1_i32 = arith.constant 1 : i32
    %c0_9 = arith.constant 0 : index
    %c0_10 = arith.constant 0 : index
    %35 = vector.load %arg6[%c0_9, %c0_10] : memref<8x128xf32, #tpu.memory_space<vmem>>, vector<8x128xf32>
    %36 = arith.addf %35, %33 : vector<8x128xf32>
    %c0_11 = arith.constant 0 : index
    %c0_12 = arith.constant 0 : index
    %37 = vector.load %arg6[%c0_11, %c0_12] : memref<8x128xf32, #tpu.memory_space<vmem>>, vector<8x128xf32>
    tpu.vector_store %arg6[%c0_11, %c0_12], %36 {strides = array<i32>} : memref<8x128xf32, #tpu.memory_space<vmem>>, vector<8x128xf32>,
    %c0_13 = arith.constant 0 : index
    %c0_14 = arith.constant 0 : index
    %38 = vector.load %arg7[%c0_13, %c0_14] : memref<8x128xf32, #tpu.memory_space<vmem>>, vector<8x128xf32>
    %39 = arith.addf %38, %34 : vector<8x128xf32>
    %c0_15 = arith.constant 0 : index
    %c0_16 = arith.constant 0 : index
    %40 = vector.load %arg7[%c0_15, %c0_16] : memref<8x128xf32, #tpu.memory_space<vmem>>, vector<8x128xf32>
    tpu.vector_store %arg7[%c0_15, %c0_16], %39 {strides = array<i32>} : memref<8x128xf32, #tpu.memory_space<vmem>>, vector<8x128xf32>,
    %c1_i32_17 = arith.constant 1 : i32
    %41 = arith.cmpi slt, %arg0, %c1_i32_17 : i32
    %42 = arith.extui %41 : i1 to i32
    %c0_i32_18 = arith.constant 0 : i32
    %43 = arith.cmpi ne, %42, %c0_i32_18 : i32
    scf.if %43 {
      %47 = tpu.iota {dimensions = array<i32: 0>} : vector<8x1xi32>
      %cst_20 = arith.constant 0.000000e+00 : f32
      %48 = vector.broadcast %cst_20 : f32 to vector<8x128xf32>
      %c0_i32_21 = arith.constant 0 : i32
      %c8_i32_22 = arith.constant 8 : i32
      %49 = arith.muli %c0_i32_21, %c8_i32_22 : i32
      %50 = tpu.assume_multiple %49, 8 : i32
      %51 = arith.index_cast %50 : i32 to index
      %c0_23 = arith.constant 0 : index
      %52 = vector.load %arg4[%51, %c0_23] : memref<8x128xf32, #tpu.memory_space<vmem>>, vector<8x128xf32>
      %c8_i32_24 = arith.constant 8 : i32
      %53 = arith.muli %arg0, %c8_i32_24 : i32
      %54 = vector.broadcast %53 : i32 to vector<8x1xi32>
      %55 = arith.addi %47, %54 : vector<8x1xi32>
      %c8_i32_25 = arith.constant 8 : i32
      %56 = arith.muli %c0_i32_21, %c8_i32_25 : i32
      %57 = vector.broadcast %56 : i32 to vector<8x1xi32>
      %58 = arith.addi %55, %57 : vector<8x1xi32>
      %c5_i32 = arith.constant 5 : i32
      %59 = vector.broadcast %c5_i32 : i32 to vector<8x1xi32>
      %60 = arith.cmpi slt, %58, %59 : vector<8x1xi32>
      %cst_26 = arith.constant 0.000000e+00 : f32
      %61 = vector.shape_cast %60 : vector<8x1xi1> to vector<8x1xi1>
      %62 = vector.broadcast %61 : vector<8x1xi1> to vector<8x128xi1>
      %63 = vector.broadcast %cst_26 : f32 to vector<8x128xf32>
      %64 = arith.select %62, %52, %63 : vector<8x128xi1>, vector<8x128xf32>
      %65 = arith.addf %48, %64 : vector<8x128xf32>
      %c1_i32_27 = arith.constant 1 : i32
      %c0_28 = arith.constant 0 : index
      %c0_29 = arith.constant 0 : index
      %66 = vector.load %arg8[%c0_28, %c0_29] : memref<8x128xf32, #tpu.memory_space<vmem>>, vector<8x128xf32>
      %67 = arith.addf %66, %65 : vector<8x128xf32>
      %c0_30 = arith.constant 0 : index
      %c0_31 = arith.constant 0 : index
      %68 = vector.load %arg8[%c0_30, %c0_31] : memref<8x128xf32, #tpu.memory_space<vmem>>, vector<8x128xf32>
      tpu.vector_store %arg8[%c0_30, %c0_31], %67 {strides = array<i32>} : memref<8x128xf32, #tpu.memory_space<vmem>>, vector<8x128xf32>,
    } else {
    }
    %c3_i32 = arith.constant 3 : i32
    %44 = arith.cmpi eq, %arg0, %c3_i32 : i32
    %45 = arith.extui %44 : i1 to i32
    %c0_i32_19 = arith.constant 0 : i32
    %46 = arith.cmpi ne, %45, %c0_i32_19 : i32
    scf.if %46 {
      %c0_20 = arith.constant 0 : index
      %c0_21 = arith.constant 0 : index
      %47 = vector.load %arg6[%c0_20, %c0_21] : memref<8x128xf32, #tpu.memory_space<vmem>>, vector<8x128xf32>
      %48 = vector.shape_cast %47 : vector<8x128xf32> to vector<1x8x128xf32>
      %cst_22 = arith.constant dense<0.000000e+00> : vector<1xf32>
      %49 = vector.multi_reduction <add>, %48, %cst_22 [1, 2] : vector<1x8x128xf32> to vector<1xf32>
      %50 = vector.shape_cast %49 : vector<1xf32> to vector<1x1x1xf32>
      %51 = vector.extract %50[0, 0, 0] : f32 from vector<1x1x1xf32>
      %c0_23 = arith.constant 0 : index
      %c0_24 = arith.constant 0 : index
      %52 = vector.load %arg7[%c0_23, %c0_24] : memref<8x128xf32, #tpu.memory_space<vmem>>, vector<8x128xf32>
      %53 = vector.shape_cast %52 : vector<8x128xf32> to vector<1x8x128xf32>
      %cst_25 = arith.constant dense<0.000000e+00> : vector<1xf32>
      %54 = vector.multi_reduction <add>, %53, %cst_25 [1, 2] : vector<1x8x128xf32> to vector<1xf32>
      %55 = vector.shape_cast %54 : vector<1xf32> to vector<1x1x1xf32>
      %56 = vector.extract %55[0, 0, 0] : f32 from vector<1x1x1xf32>
      %cst_26 = arith.constant 9.99999993E-9 : f32
      %57 = arith.addf %56, %cst_26 : f32
      %58 = arith.divf %51, %57 : f32
      %c0_27 = arith.constant 0 : index
      %c0_28 = arith.constant 0 : index
      %59 = vector.load %arg8[%c0_27, %c0_28] : memref<8x128xf32, #tpu.memory_space<vmem>>, vector<8x128xf32>
      %cst_29 = arith.constant dense<0.000000e+00> : vector<128xf32>
      %60 = vector.multi_reduction <add>, %59, %cst_29 [0] : vector<8x128xf32> to vector<128xf32>
      %61 = vector.shape_cast %60 : vector<128xf32> to vector<1x128xf32>
      %c16_i32 = arith.constant 16 : i32
      %62 = tpu.dynamic_rotate %61 by %c16_i32 dim 1 : vector<1x128xf32>, i32 -> vector<1x128xf32>
      %63 = arith.addf %61, %62 : vector<1x128xf32>
      %c32_i32 = arith.constant 32 : i32
      %64 = tpu.dynamic_rotate %61 by %c32_i32 dim 1 : vector<1x128xf32>, i32 -> vector<1x128xf32>
      %65 = arith.addf %63, %64 : vector<1x128xf32>
      %c48_i32 = arith.constant 48 : i32
      %66 = tpu.dynamic_rotate %61 by %c48_i32 dim 1 : vector<1x128xf32>, i32 -> vector<1x128xf32>
      %67 = arith.addf %65, %66 : vector<1x128xf32>
      %c64_i32 = arith.constant 64 : i32
      %68 = tpu.dynamic_rotate %61 by %c64_i32 dim 1 : vector<1x128xf32>, i32 -> vector<1x128xf32>
      %69 = arith.addf %67, %68 : vector<1x128xf32>
      %c80_i32 = arith.constant 80 : i32
      %70 = tpu.dynamic_rotate %61 by %c80_i32 dim 1 : vector<1x128xf32>, i32 -> vector<1x128xf32>
      %71 = arith.addf %69, %70 : vector<1x128xf32>
      %c96_i32 = arith.constant 96 : i32
      %72 = tpu.dynamic_rotate %61 by %c96_i32 dim 1 : vector<1x128xf32>, i32 -> vector<1x128xf32>
      %73 = arith.addf %71, %72 : vector<1x128xf32>
      %c112_i32 = arith.constant 112 : i32
      %74 = tpu.dynamic_rotate %61 by %c112_i32 dim 1 : vector<1x128xf32>, i32 -> vector<1x128xf32>
      %75 = arith.addf %73, %74 : vector<1x128xf32>
      %76 = vector.shape_cast %75 : vector<1x128xf32> to vector<1x1x128xf32>
      %cst_30 = arith.constant dense<0.000000e+00> : vector<1xf32>
      %77 = vector.multi_reduction <add>, %76, %cst_30 [1, 2] : vector<1x1x128xf32> to vector<1xf32>
      %78 = vector.shape_cast %77 : vector<1xf32> to vector<1x1x1xf32>
      %79 = vector.extract %78[0, 0, 0] : f32 from vector<1x1x1xf32>
      %cst_31 = arith.constant 1.280000e+02 : f32
      %80 = arith.divf %79, %cst_31 : f32
      %81 = vector.broadcast %80 : f32 to vector<1x128xf32>
      %82 = arith.subf %75, %81 : vector<1x128xf32>
      %83 = arith.mulf %82, %82 : vector<1x128xf32>
      %84 = vector.shape_cast %83 : vector<1x128xf32> to vector<1x1x128xf32>
      %cst_32 = arith.constant dense<0.000000e+00> : vector<1xf32>
      %85 = vector.multi_reduction <add>, %84, %cst_32 [1, 2] : vector<1x1x128xf32> to vector<1xf32>
      %86 = vector.shape_cast %85 : vector<1xf32> to vector<1x1x1xf32>
      %87 = vector.extract %86[0, 0, 0] : f32 from vector<1x1x1xf32>
      %cst_33 = arith.constant 1.200000e+02 : f32
      %88 = arith.divf %87, %cst_33 : f32
      %cst_34 = arith.constant 9.99999993E-9 : f32
      %89 = arith.addf %80, %cst_34 : f32
      %90 = arith.mulf %89, %89 : f32
      %91 = arith.divf %88, %90 : f32
      %cst_35 = arith.constant 1.000000e-01 : f32
      %92 = arith.mulf %cst_35, %91 : f32
      %93 = arith.addf %58, %92 : f32
      %c0_36 = arith.constant 0 : index
      %c0_37 = arith.constant 0 : index
      %94 = memref.load %arg5[%c0_36, %c0_37] : memref<1x1xf32, #tpu.memory_space<smem>>
      memref.store %93, %arg5[%c0_36, %c0_37] : memref<1x1xf32, #tpu.memory_space<smem>>
    } else {
    }
    return
  }
  func.func @transform_0(%arg0: i32) -> (i32, i32) {
    %c0_i32 = arith.constant 0 : i32
    %c0_i32_0 = arith.constant 0 : i32
    return %arg0, %c0_i32 : i32, i32
  }
  func.func @transform_1(%arg0: i32) -> (i32, i32) {
    %c0_i32 = arith.constant 0 : i32
    %c0_i32_0 = arith.constant 0 : i32
    return %arg0, %c0_i32 : i32, i32
  }
  func.func @transform_2(%arg0: i32) -> (i32, i32) {
    %c0_i32 = arith.constant 0 : i32
    %c0_i32_0 = arith.constant 0 : i32
    return %arg0, %c0_i32 : i32, i32
  }
  func.func @transform_3(%arg0: i32) -> (i32, i32) {
    %c0_i32 = arith.constant 0 : i32
    %0 = arith.minsi %arg0, %c0_i32 : i32
    %c0_i32_0 = arith.constant 0 : i32
    %c0_i32_1 = arith.constant 0 : i32
    return %0, %c0_i32_0 : i32, i32
  }
  func.func @transform_4(%arg0: i32) -> (i32, i32) {
    %c0_i32 = arith.constant 0 : i32
    %c0_i32_0 = arith.constant 0 : i32
    %c0_i32_1 = arith.constant 0 : i32
    return %c0_i32, %c0_i32_0 : i32, i32
  }
}

</mosaic_0001>

<bundles_post_ra>
// kernel: tpu_custom_call.1
= control target key start
LH: loop header
LB: loop body
LE: loop exit
PB: predicated region body
PF: predicated region fallthrough
CT: control target
= control target key end

     0   :  { %9 = vsyncpa [#allocation6], 0  ;;  %s1065_s0 = inlined_call_operand.hbm [shape: f32[27,128], index: 0, kind: input, shape index: {}]   ;;  %s1066_s1 = inlined_call_operand.hbm [shape: f32[27,128], index: 1, kind: input, shape index: {}]   ;;  %s1067_s2 = inlined_call_operand.hbm [shape: f32[27,128], index: 2, kind: input, shape index: {}]   ;;  %s1068_s3 = inlined_call_operand.vmem [shape: f32[5,128], index: 3, kind: input, shape index: {}]   ;;  %s1069_s4 = inlined_call_operand.hbm [shape: f32[1,1], index: 4, kind: output, shape index: {}]  }
   0x1   :  { %11 = vsyncpa [#allocation6 + $0x1], 0 }
   0x2   :  { %12 = vsyncpa [#allocation9], 0 }
   0x3   :  { %14 = vsyncpa [#allocation9 + $0x1], 0 }
   0x4   :  { %15 = vsyncpa [#allocation7], 0  ;;  %s843_s15 = smov 0   ;;  %s845_s16 = smov 0  }
   0x5   :  { %s847_s17 = smov 0   ;;  %s849_s18 = smov 0  }
   0x6 LB: > { %s862_s19 = sadd.s32 4294967295, %s804_s18   ;;  %s865_s20 = sadd.s32 1, %s804_s18   ;;  %s804_s18 = sphi %s849_s18, %s1084_s18   ;;  %s800_s17 = sphi %s847_s17, %s1083_s17   ;;  %s796_s16 = sphi %s845_s16, %s1082_s16   ;;  %s792_s15 = sphi %s843_s15, %s1081_s15  }
   0x7   : > { %s25_s21 = ssub.s32 %s804_s18, %s865_s20  ;;  %s28_s22 = sadd.s32 1, %s800_s17 }
   0x8   : > { %p26_p0 = scmp.eq.s32.totalorder %s25_s21, 0  ;;  %p35_p1 = scmp.ne.s32.totalorder %s800_s17, %s796_s16 }
   0x9   : > { %p36_p2 = scmp.eq.s32.totalorder %s804_s18, 0  ;;  %p41_p3 = scmp.ne.s32.totalorder %s796_s16, %s792_s15 }
   0xa   : > { %s875_s23 = scalar_select %p26_p0, %s800_s17, %s28_s22  }
   0xb   : > { %p37_p4 = por %p36_p2, %p35_p1  ;;  %p42_p5 = scmp.eq.s32.totalorder %s862_s19, 0 }
   0xc   : > { %p612_p6 = scmp.lt.s32.totalorder %s804_s18, 4  ;;  %s168_s25 = sand.u32 1, %s800_s17  }
   0xd   : > { %p879_p7 = por %p42_p5, %p41_p3  ;;  %s886_s26 = sshll.u32 %s168_s25, 3 }
   0xe   : > { %s889_s27 = sshll.u32 %s804_s18, 7  ;;  %p891_p8 = pnand %p612_p6, %p37_p4 }
   0xf   : > { %s1072_s24 = scalar_select %p879_p7, 1, 0 }
  0x10   : > { %s1073_s28 = scalar_select %p891_p8, 1, 0 }
  0x11   : > { %s186_s29 = sand.u32 1, %s804_s18   ;;  %s900_s6 = scalar_lea.hbm %s1066_s1, %s889_s27 }
  0x12   : > { %s190_s7 = scalar_lea.vmem [#allocation8], %s886_s26  ;;  %s907_s9 = scalar_lea.sflag [#allocation9], %s186_s29 }
  0x13   : > { %s197_s8 = sshll.u32 %s190_s7, 4  ;;  %s660_s10 = scalar_lea.hbm %s900_s6, 128  ;;  %s904_s8 = int_to_ptr.vmem [resolvable:$true] %s197_s8 }
  0x14   : > { %p661_p11 = scmp.ne.s32.totalorder %s900_s6, %s660_s10  ;;  %p913_p12 = pneg %p891_p8 }
  0x15   : > { %s665_s14 = scalar_lea.hbm %s1066_s1, 512  ;;  %p666_p1 = scmp.lt.u32.totalorder %s900_s6, %s1066_s1 }
  0x16   : > { %p663_p13 = pnand %p913_p12, %p661_p11  ;;  %p667_p2 = scmp.lt.u32.totalorder %s665_s14, %s660_s10 }
  0x17   : > { %p669_p4 = scmp.lt.u32.totalorder %s660_s10, %s900_s6 }
  0x18   : > { %p664_p0 = pneg %p663_p13  ;;  %p668_p3 = por %p667_p2, %p666_p1 }
  0x1a   : > { %p670_p5 = por %p669_p4, %p668_p3 }
  0x1c   : > { %p671_p6 = pnand %p670_p5, %p664_p0 }
  0x1e   : > { %674 = shalt.err (!%p671_p6)
}
  0x1f   : > { %s675_s22 = scalar_lea.vmem %s904_s8, 128  ;;  %s806_s29 = smov [#allocation8]  }
  0x20   : > { %p676_p11 = scmp.ne.s32.totalorder %s904_s8, %s675_s22  ;;  %s680_s30 = sshll.u32 %s806_s29, 4  ;;  %s681_s30 = int_to_ptr.vmem [resolvable:$false] %s680_s30 }
  0x21   : > { %s682_s5 = scalar_lea.vmem %s681_s30, 256  ;;  %p683_p10 = scmp.lt.s32.totalorder %s904_s8, %s681_s30 }
  0x22   : > { %p678_p13 = pnand %p676_p11, %p913_p12  ;;  %p684_p7 = scmp.lt.s32.totalorder %s682_s5, %s675_s22 }
  0x24   : > { %p679_p9 = pneg %p678_p13  ;;  %p685_p1 = por %p684_p7, %p683_p10 }
  0x26   : > { %p686_p2 = pnand %p685_p1, %p679_p9 }
  0x28   : > { %689 = shalt.err (!%p686_p2)
}
  0x29   : > { %608 = dma.hbm_to_vmem [thread:$0]  (!%p891_p8), %s900_s6, 128, %s904_s8, %s907_s9  }
  0x2a   : > { %p1075_p0 = scmp.lt.s32.totalorder %s804_s18, 5  ;;  %p1076_p3 = scmp.ge.s32.totalorder %s804_s18, 1 }
  0x2b   : > { %s949_s13 = scalar_lea.hbm %s1065_s0, %s889_s27  ;;  %s172_s14 = scalar_lea.vmem [#allocation5], %s886_s26 }
  0x2c   : > { %p941_p4 = pnand %p1076_p3, %p1075_p0  ;;  %s179_s15 = sshll.u32 %s172_s14, 4  ;;  %s952_s15 = int_to_ptr.vmem [resolvable:$true] %s179_s15 }
  0x2d   : > { %s958_s18 = scalar_lea.hbm %s1067_s2, %s889_s27  ;;  %s169_s21 = scalar_lea.sflag [#allocation6], %s168_s25 }
  0x2e   : > { %s1077_s7 = scalar_select %p941_p4, 1, 0 }
  0x2f   : > { %s690_s22 = scalar_lea.hbm %s949_s13, 128  ;;  %s695_s5 = scalar_lea.hbm %s1065_s0, 512 }
  0x30   : > { %p691_p7 = scmp.ne.s32.totalorder %s949_s13, %s690_s22  ;;  %p696_p5 = scmp.lt.u32.totalorder %s949_s13, %s1065_s0 }
  0x31   : > { %p697_p6 = scmp.lt.u32.totalorder %s695_s5, %s690_s22  ;;  %p699_p13 = scmp.lt.u32.totalorder %s690_s22, %s949_s13 }
  0x32   : > { %p693_p9 = pnand %p691_p7, %p913_p12 }
  0x33   : > { %p698_p11 = por %p697_p6, %p696_p5 }
  0x34   : > { %p694_p10 = pneg %p693_p9 }
  0x35   : > { %p700_p1 = por %p699_p13, %p698_p11 }
  0x37   : > { %p701_p2 = pnand %p700_p1, %p694_p10 }
  0x39   : > { %704 = shalt.err (!%p701_p2)
}
  0x3a   : > { %s705_s25 = scalar_lea.vmem %s952_s15, 128  ;;  %s807_s27 = smov [#allocation5]  }
  0x3b   : > { %p706_p0 = scmp.ne.s32.totalorder %s952_s15, %s705_s25  ;;  %s710_s14 = sshll.u32 %s807_s27, 4  ;;  %s711_s14 = int_to_ptr.vmem [resolvable:$false] %s710_s14 }
  0x3c   : > { %s712_s6 = scalar_lea.vmem %s711_s14, 256  ;;  %p713_p9 = scmp.lt.s32.totalorder %s952_s15, %s711_s14 }
  0x3d   : > { %p708_p3 = pnand %p706_p0, %p913_p12  ;;  %p714_p4 = scmp.lt.s32.totalorder %s712_s6, %s705_s25 }
  0x3f   : > { %p709_p7 = pneg %p708_p3  ;;  %p715_p5 = por %p714_p4, %p713_p9 }
  0x41   : > { %p716_p6 = pnand %p715_p5, %p709_p7 }
  0x43   : > { %719 = shalt.err (!%p716_p6)
}
  0x44   : > { %605 = dma.hbm_to_vmem [thread:$0]  (!%p891_p8), %s949_s13, 128, %s952_s15, %s169_s21  }
  0x45   : > { %s208_s8 = scalar_lea.vmem [#allocation10], %s886_s26  ;;  %s720_s29 = scalar_lea.hbm %s958_s18, 128 }
  0x46   : > { %s215_s22 = sshll.u32 %s208_s8, 4  ;;  %p721_p10 = scmp.ne.s32.totalorder %s958_s18, %s720_s29  ;;  %s216_s22 = int_to_ptr.vmem [resolvable:$true] %s215_s22 }
  0x47   : > { %s725_s10 = scalar_lea.hbm %s1067_s2, 512  ;;  %p726_p13 = scmp.lt.u32.totalorder %s958_s18, %s1067_s2 }
  0x48   : > { %p723_p4 = pnand %p721_p10, %p913_p12  ;;  %p727_p1 = scmp.lt.u32.totalorder %s725_s10, %s720_s29 }
  0x49   : > { %p729_p0 = scmp.lt.u32.totalorder %s720_s29, %s958_s18 }
  0x4a   : > { %p724_p11 = pneg %p723_p4  ;;  %p728_p2 = por %p727_p1, %p726_p13 }
  0x4c   : > { %p730_p3 = por %p729_p0, %p728_p2 }
  0x4e   : > { %p731_p7 = pnand %p730_p3, %p724_p11 }
  0x50   : > { %734 = shalt.err (!%p731_p7)
}
  0x51   : > { %s735_s26 = scalar_lea.vmem %s216_s22, 128  ;;  %s808_s13 = smov [#allocation10]  }
  0x52   : > { %p736_p9 = scmp.ne.s32.totalorder %s216_s22, %s735_s26  ;;  %s740_s15 = sshll.u32 %s808_s13, 4  ;;  %s741_s15 = int_to_ptr.vmem [resolvable:$false] %s740_s15 }
  0x53   : > { %s742_s21 = scalar_lea.vmem %s741_s15, 256  ;;  %p743_p10 = scmp.lt.s32.totalorder %s216_s22, %s741_s15 }
  0x54   : > { %p738_p5 = pnand %p736_p9, %p913_p12  ;;  %p744_p4 = scmp.lt.s32.totalorder %s742_s21, %s735_s26 }
  0x56   : > { %p739_p6 = pneg %p738_p5  ;;  %p745_p8 = por %p744_p4, %p743_p10 }
  0x58   : > { %p746_p1 = pnand %p745_p8, %p739_p6 }
  0x5a   : > { %749 = shalt.err (!%p746_p1)
}
  0x5b   : > { %p1078_p13 = scmp.ne.s32.totalorder %s1073_s28, 0  ;;  %p1079_p11 = scmp.ne.s32.totalorder %s1077_s7, 0 }
  0x5c   : > { %s237_s11 = sand.u32 (!%p1079_p11), 1, %s796_s16   ;;  %p1080_p12 = scmp.ne.s32.totalorder (!%p1079_p11), %s1072_s24, 0 }
  0x5d   : > { %611 = dma.hbm_to_vmem [thread:$0]  (!%p1078_p13), %s958_s18, 128, %s216_s22, %s907_s9  }
  0x5e   : > { %235 = sbr.rel (%p1079_p11) target bundleno = 776 (0x308), region = 36  ;;  %s1005_s27 = sshll.u32 (!%p1079_p11), %s237_s11, 3 }
  0x5f   : > { %s238_s14 = scalar_lea.sflag (!%p1079_p11), [#allocation6], %s237_s11  ;;  %s241_s6 = scalar_lea.vmem (!%p1079_p11), [#allocation5], %s1005_s27 }
  0x65   : > { %779 = dma.done.wait (%p1080_p12), %s238_s14, 128  }
  0x66   : > { %781 = vsyncadd (%p1080_p12), %s238_s14, 4294967168  ;;  %s246_s28 = sand.u32 1, %s862_s19   ;;  %s250_s7 = scalar_lea.vmem [#allocation8], %s1005_s27 }
  0x67   : > { %s247_s9 = scalar_lea.sflag [#allocation9], %s246_s28 }
  0x68   : > { %783 = dma.done.wait (%p1080_p12), %s247_s9, 256  }
  0x69   : > { %785 = vsyncadd (%p1080_p12), %s247_s9, 4294967040  ;;  %p295_p8 = scmp.lt.s32.totalorder %s862_s19, 0  ;;  %s259_s5 = scalar_lea.vmem [#allocation10], %s1005_s27 }
  0x6a   : > { %p572_p2 = scmp.ne.s32.totalorder %s862_s19, 0 }
  0x6b   : > { %s296_s18 = scalar_select %p295_p8, %s862_s19, 0 }
  0x6c   : > { %306 = sbr.rel (%p572_p2) target bundleno = 115 (0x73), region = 52  ;;  %v809_v0 = vmov (!%p572_p2), 0.0  }
  0x6d   : > { %s1086_s18 = smov (!%p295_p8, %s296_s18), 0  ;;  %307 = vst [vmem:[#allocation2] sm:$0xff] (!%p572_p2), %v809_v0  ;;  %308 = vst [vmem:[#allocation3] sm:$0xff] (!%p572_p2), %v809_v0 }
  0x6e   : > { %s571_s8 = sshll.u32 %s1086_s18, 3  ;;  %309 = vst [vmem:[#allocation4] sm:$0xff] (!%p572_p2), %v809_v0 }
  0x6f   : > { %s1023_s30 = scalar_lea.vmem %s1068_s3, %s571_s8 }
  0x73 PF: > { %v310_v1 = vlaneseq  ;;  %v312_v2 = vld [vmem:[%s241_s6] sm:$0xff]  ;;  %v313_v3 = vld [vmem:[%s250_s7] sm:$0xff]  ;;  %s573_s24 = sshll.u32 %s862_s19, 3  ;;  %p574_p0 = scmp.ge.s32.totalorder %s862_s19, 1 }
  0x74   : > { %v316_v4 = vstv %s573_s24  ;;  %v319_v5 = vsub.f32 %v312_v2, %v313_v3  ;;  %v314_v7 = vld [vmem:[%s259_s5] sm:$0xff]  ;;  %v331_v12 = vld [vmem:[#allocation3] sm:$0xff] }
  0x75   : > { %v311_v6 = vshrl.u32 %v310_v1, 7  ;;  %v328_v11 = vld [vmem:[#allocation2] sm:$0xff]  ;;  %v344_v18 = vld [vmem:[#allocation4] sm:$0xff] (!%p574_p0) }
  0x76   : > { %v320_v8 = vmul.f32 %v319_v5, %v319_v5  ;;  %v338_v17 = vld [vmem:[%s1023_s30] sm:$0xff] (!%p574_p0) }
  0x77   : > { %v317_v9 = vadd.s32 %v316_v4, %v311_v6  ;;  %337 = sbr.rel (%p574_p0) target bundleno = 127 (0x7f), region = 56 }
  0x78   : > { %v321_v10 = vmul.f32 %v320_v8, %v314_v7 }
  0x79   : > { %vm318_vm0 = vcmp.lt.s32.totalorder %v317_v9, 27  ;;  %vm339_vm1 = vcmp.lt.s32.totalorder (!%p574_p0), %v317_v9, 5 }
  0x7a   : > { %v324_v13 = vsel %vm318_vm0, %v321_v10, 0.0  ;;  %v325_v14 = vsel %vm318_vm0, %v314_v7, 0.0  ;;  %v342_v19 = vsel (!%p574_p0), %vm339_vm1, %v338_v17, 0.0 }
  0x7b   : > { %v329_v15 = vadd.f32 %v328_v11, %v324_v13  ;;  %v332_v16 = vadd.f32 %v331_v12, %v325_v14  ;;  %v345_v20 = vadd.f32 (!%p574_p0), %v344_v18, %v342_v19 }
  0x7d   : > { %330 = vst [vmem:[#allocation2] sm:$0xff] %v329_v15  ;;  %333 = vst [vmem:[#allocation3] sm:$0xff] %v332_v16 }
  0x7e   : > { %346 = vst [vmem:[#allocation4] sm:$0xff] %v345_v20 }
  0x7f PF: > { %p575_p3 = scmp.ne.s32.totalorder %s862_s19, 3 }
  0x80   : > { %s810_s10 = smov (!%p575_p3), 48   ;;  %s811_s12 = smov (!%p575_p3), 16   ;;  %vm404_vm2 = vcmask (!%p575_p3), 1040384  }
  0x81   : > { %350 = sbr.rel (%p575_p3) target bundleno = 761 (0x2f9), region = 60  ;;  %s812_s25 = smov (!%p575_p3), 64  }
  0x82   : > { %s813_s26 = smov (!%p575_p3), 32   ;;  %s814_s13 = smov (!%p575_p3), 80  }
  0x83   : > { %s815_s15 = smov (!%p575_p3), 112   ;;  %s816_s21 = smov (!%p575_p3), 96  }
  0x85   : > { %v376_v21 = vld [vmem:[#allocation4] sm:$0xff] (!%p575_p3)  ;;  %v361_v28 = vld [vmem:[#allocation3] sm:$0xff] (!%p575_p3)  ;;  %v351_v29 = vld [vmem:[#allocation2] sm:$0xff] (!%p575_p3) }
  0x86   : > { %v377_v22 = vrot.slane (!%p575_p3), %v376_v21, 4 }
  0x88   : > { %v378_v23 = vadd.f32 %v377_v22, %v376_v21 }
  0x8a   : > { %v379_v24 = vrot.slane %v378_v23, 2 }
  0x8c   : > { %v380_v25 = vadd.f32 %v379_v24, %v378_v23 }
  0x8e   : > { %v381_v26 = vrot.slane %v380_v25, 1 }
  0x90   : > { %v382_v27 = vadd.f32 %v381_v26, %v380_v25 }
  0x92   : > { %389 = vrot.lane.b32.xlu1 %v382_v27, %s810_s10  ;;  %383 = vrot.lane.b32.xlu0 %v382_v27, %s811_s12 }
  0x96   : > { %392 = vrot.lane.b32.xlu1 %v382_v27, %s812_s25  ;;  %386 = vrot.lane.b32.xlu0 %v382_v27, %s813_s26 }
  0x9a   : > { %395 = vrot.lane.b32.xlu0 %v382_v27, %s814_s13 }
  0xb9   : > { %362 = vadd.xlane.f32.xlu0 %v361_v28 }
  0xba   : > { %352 = vadd.xlane.f32.xlu1 %v351_v29 }
  0xcb   : > { %401 = vrot.lane.b32.xlu1 %v382_v27, %s815_s15 }
  0xcf   : > { %398 = vrot.lane.b32.xlu0 %v382_v27, %s816_s21 }
 0x104   : > { %v384_v30 = vpop.permute.xlu0 %383  ;;  %v390_v33 = vpop.permute.xlu1 %389 }
 0x105   : > { %v385_v32 = vadd.f32 %v384_v30, %v382_v27 }
 0x108   : > { %v387_v31 = vpop.permute.xlu0 %386  ;;  %v393_v37 = vpop.permute.xlu1 %392 }
 0x109   : > { %v388_v34 = vadd.f32 %v387_v31, %v385_v32 }
 0x10b   : > { %v391_v35 = vadd.f32 %v390_v33, %v388_v34 }
 0x10c   : > { %v396_v36 = vpop.permute.xlu0 %395 }
 0x10d   : > { %v394_v38 = vadd.f32 %v393_v37, %v391_v35 }
 0x10f   : > { %v397_v43 = vadd.f32 %v396_v36, %v394_v38 }
 0x146   : > { %v363_v39 = vpop.xlane.xlu0 %362 }
 0x147   : > { %v364_v40 = vrot.slane %v363_v39, 4  ;;  %v353_v41 = vpop.xlane.xlu1 %352 }
 0x148   : > { %v354_v42 = vrot.slane %v353_v41, 4 }
 0x149   : > { %v365_v44 = vadd.f32 %v364_v40, %v363_v39 }
 0x14a   : > { %v355_v45 = vadd.f32 %v354_v42, %v353_v41  ;;  %v399_v46 = vpop.permute.xlu0 %398 }
 0x14b   : > { %v366_v47 = vrot.slane %v365_v44, 2  ;;  %v400_v48 = vadd.f32 %v399_v46, %v397_v43  ;;  %v402_v49 = vpop.permute.xlu1 %401 }
 0x14c   : > { %v356_v50 = vrot.slane %v355_v45, 2 }
 0x14d   : > { %v403_v51 = vadd.f32 %v402_v49, %v400_v48  ;;  %v367_v52 = vadd.f32 %v366_v47, %v365_v44 }
 0x14e   : > { %v357_v53 = vadd.f32 %v356_v50, %v355_v45 }
 0x14f   : > { %v405_v54 = vsel %vm404_vm2, %v403_v51, 0.0  ;;  %v368_v55 = vrot.slane %v367_v52, 1 }
 0x150   : > { %406 = vadd.xlane.f32.xlu1 %v405_v54  ;;  %v358_v56 = vrot.slane %v357_v53, 1 }
 0x151   : > { %v369_v57 = vadd.f32 %v368_v55, %v367_v52 }
 0x152   : > { %v359_v58 = vadd.f32 %v358_v56, %v357_v53 }
 0x154   : > { %580 = vpush %v359_v58 }
 0x155   : > { %582 = vpush %v369_v57 }
 0x185   : > { %s1032_s11 = spop %580 }
 0x186   : > { %s583_s27 = spop %582 }
 0x187   : > { %s371_s14 = sadd.f32 1e-08, %s583_s27 }
 0x189   : > { %v372_v59 = vstv %s371_s14 }
 0x18a   : > { %656 = vrcp.f32 %v372_v59 }
 0x194   : > { %v657_v60 = vpop.eup %656 }
 0x195   : > { %584 = vpush %v657_v60 }
 0x1c6   : > { %s1034_s6 = spop %584 }
 0x1c7   : > { %s375_s5 = smul.f32 %s1034_s6, %s1032_s11 }
 0x1dd   : > { %v407_v61 = vpop.xlane.xlu1 %406 }
 0x1de   : > { %v408_v62 = vrot.slane %v407_v61, 4 }
 0x1e0   : > { %v409_v63 = vadd.f32 %v408_v62, %v407_v61 }
 0x1e2   : > { %v410_v0 = vrot.slane %v409_v63, 2 }
 0x1e4   : > { %v411_v1 = vadd.f32 %v410_v0, %v409_v63 }
 0x1e6   : > { %v412_v2 = vrot.slane %v411_v1, 1 }
 0x1e8   : > { %v413_v3 = vadd.f32 %v412_v2, %v411_v1 }
 0x1ea   : > { %586 = vpush %v413_v3 }
 0x21b   : > { %s587_s28 = spop %586 }
 0x21c   : > { %s417_s9 = smul.f32 0.0078125, %s587_s28 }
 0x21e   : > { %v418_v4 = vstv %s417_s9  ;;  %s434_s7 = sadd.f32 1e-08, %s417_s9 }
 0x21f   : > { %v419_v5 = vsub.f32 %v403_v51, %v418_v4 }
 0x220   : > { %s435_s18 = smul.f32 %s434_s7, %s434_s7 }
 0x221   : > { %v420_v6 = vmul.f32 %v419_v5, %v419_v5 }
 0x222   : > { %v436_v8 = vstv %s435_s18 }
 0x223   : > { %v421_v7 = vsel %vm404_vm2, %v420_v6, 0.0  ;;  %658 = vrcp.f32 %v436_v8 }
 0x224   : > { %422 = vadd.xlane.f32.xlu0 %v421_v7 }
 0x22d   : > { %v659_v16 = vpop.eup %658 }
 0x2b1   : > { %v423_v9 = vpop.xlane.xlu0 %422 }
 0x2b2   : > { %v424_v10 = vrot.slane %v423_v9, 4 }
 0x2b4   : > { %v425_v11 = vadd.f32 %v424_v10, %v423_v9 }
 0x2b6   : > { %v426_v12 = vrot.slane %v425_v11, 2 }
 0x2b8   : > { %v427_v13 = vadd.f32 %v426_v12, %v425_v11 }
 0x2ba   : > { %v428_v14 = vrot.slane %v427_v13, 1 }
 0x2bc   : > { %v429_v15 = vadd.f32 %v428_v14, %v427_v13 }
 0x2be   : > { %588 = vpush %v429_v15 }
 0x2bf   : > { %590 = vpush %v659_v16 }
 0x2ef   : > { %s589_s8 = spop %588 }
 0x2f0   : > { %s433_s22 = smul.f32 0.008333334, %s589_s8  ;;  %s591_s29 = spop %590 }
 0x2f2   : > { %s439_s30 = smul.f32 %s591_s29, %s433_s22 }
 0x2f4   : > { %s440_s24 = smul.f32 0.1, %s439_s30 }
 0x2f6   : > { %s441_s10 = sadd.f32 %s440_s24, %s375_s5 }
 0x2f8   : > { %443 = sst [smem:[#allocation11]] %s441_s10 }
 0x2f9 PF: > { %p613_p7 = scmp.eq.s32.totalorder %s862_s19, 3  ;;  %s750_s26 = scalar_lea.hbm %s1069_s4, 16 }
 0x2fa   : > { %p751_p9 = scmp.ne.s32.totalorder %s1069_s4, %s750_s26  ;;  %p756_p10 = scmp.lt.u32.totalorder %s750_s26, %s1069_s4 }
 0x2fc   : > { %p752_p5 = pnand %p751_p9, %p613_p7 }
 0x2fe   : > { %p753_p6 = pneg %p752_p5 }
 0x300   : > { %p758_p4 = pnand %p756_p10, %p753_p6 }
 0x302   : > { %761 = shalt.err (!%p758_p4)
}
 0x303   : > { %s817_s11 = smov [#allocation11]  }
 0x304   : > { %599 = dma.smem_to_hbm (%p613_p7), %s817_s11, 16, %s1069_s4, [#allocation7]  }
 0x305   : > { %787 = dma.done.wait (%p613_p7), [#allocation7], 16  }
 0x306   : > { %789 = vsyncadd (%p613_p7), [#allocation7], 4294967280 }
 0x307   : > { %457 = sfence }
 0x308 PF: > { %p18_p1 = scmp.ge.s32.totalorder %s865_s20, 6   ;;  %s1081_s15 = smov %s796_s16 }
 0x309   : > { %s1082_s16 = smov %s800_s17  ;;  %s1083_s17 = smov %s875_s23 }
 0x30a   : > { %s1084_s18 = smov %s865_s20  ;;  %20 = sbr.rel (!%p18_p1) target bundleno = 6 (0x6), region = 113 }
 0x311   :  { %463 = vsyncpa [#allocation6], 1 }
 0x312   :  { %465 = vsyncpa [#allocation6 + $0x1], 1 }
 0x313   :  { %466 = vsyncpa [#allocation9], 1 }
 0x314   :  { %468 = vsyncpa [#allocation9 + $0x1], 1 }
 0x315   :  { %469 = vsyncpa [#allocation7], 1 }
 0x316   :  { %471 = vsyncpa [#allocation7 + $0x1], 1 }

</bundles_post_ra>
